<compile_context>
chip_gen: v7x
topology: tpu7x:2x2x1
jax: 0.10.0
libtpu: 0.0.40
codegen_flags: <defaults>
</compile_context>

<pallas_src>
import jax
import jax.numpy as jnp
from jax.experimental import pallas as pl
from jax.experimental.pallas import tpu as pltpu

_LANES = 128
_SUBLANES = 8
_MIN_SPLIT_BYTES = 1 * 1024 * 1024  # above this, force >= 2 blocks (v7x TCs)


def _cdiv(a, b):
    return -(-a // b)


def _round_up(a, b):
    return _cdiv(a, b) * b


def _vmem_capacity_bytes():
    """Physical VMEM per TensorCore; conservative fallback if unqueryable."""
    try:
        info = pltpu.get_tpu_info()
        cap = int(getattr(info, "vmem_capacity_bytes", 0) or 0)
        if cap > 0:
            return cap
    except Exception:
        pass
    return 64 * 1024 * 1024  # v7x per-TC VMEM: smallest of current generations


def _block_budget_bytes(vmem_cap):
    # Effective VMEM use ~= 4x block bytes (input + output, double-buffered).
    if vmem_cap >= 96 * 1024 * 1024:   # v5e / v6e: 128 MiB physical VMEM
        return 6 * 1024 * 1024
    return 4 * 1024 * 1024             # v7x: 64 MiB physical per TC


def _pick_tm(m, itemsize, budget_bytes):
    """Rows per block (lane dim is always 128)."""
    bytes_per_row = _LANES * itemsize
    full_bytes = m * bytes_per_row
    if full_bytes <= _MIN_SPLIT_BYTES:
        # Tiny input: a single full-extent block (allowed even if m % 8 != 0).
        return m
    # VMEM-budget-limited row count, multiple of 8 sublanes.
    max_rows = max(_SUBLANES,
                   (budget_bytes // bytes_per_row) // _SUBLANES * _SUBLANES)
    # At least two blocks so both v7x TensorCores get work on the "parallel"
    # axis; one extra grid step is noise on single-TC v5e/v6e.
    half_rows = _round_up(_cdiv(m, 2), _SUBLANES)
    return min(max_rows, half_rows)


def _linear_kernel(w_ref, b_ref, x_ref, o_ref):
    # w_ref / b_ref: (1,) f32 scalar-prefetch refs (SMEM).
    # x_ref / o_ref: (tm, 128) VMEM tiles.
    x = x_ref[...].astype(jnp.float32)
    y = w_ref[0] * x + b_ref[0]          # FMA in f32, cast only at the store
    o_ref[...] = y.astype(o_ref.dtype)


def linear_model_forward(x, weight, bias, *, donate_x=False):
    """y = weight * x + bias elementwise; weight/bias are shape-(1,) scalars."""
    orig_shape = x.shape
    orig_dtype = x.dtype
    total = x.size

    x_flat = x.reshape(-1)               # free (bitcast) for contiguous x
    rem = total % _LANES
    if rem:
        # TODO(synk): sizes not a multiple of 128 still pay a pad copy; a
        # fully pad-free path would need an in-kernel masked tail store.
        x_flat = jnp.pad(x_flat, (0, _LANES - rem))
    m = x_flat.size // _LANES
    x2d = x_flat.reshape(m, _LANES)

    itemsize = jnp.dtype(orig_dtype).itemsize
    vmem_cap = _vmem_capacity_bytes()
    budget = _block_budget_bytes(vmem_cap)
    tm = _pick_tm(m, itemsize, budget)
    num_blocks = _cdiv(m, tm)             # ragged last block is masked by Pallas

    block_bytes = tm * _LANES * itemsize
    vmem_limit = min(vmem_cap // 2,
                     max(16 * 1024 * 1024, 4 * block_bytes + 4 * 1024 * 1024))

    # Scalar-prefetch params: (1,) f32 arrays land in SMEM before the grid.
    w1 = jnp.asarray(weight, jnp.float32).reshape(1)
    b1 = jnp.asarray(bias, jnp.float32).reshape(1)

    cost = pl.CostEstimate(
        flops=2 * total,
        transcendentals=0,
        bytes_accessed=2 * x2d.size * itemsize,   # read x + write y (HBM-bound)
    )

    out2d = pl.pallas_call(
        _linear_kernel,
        out_shape=jax.ShapeDtypeStruct((m, _LANES), orig_dtype),
        grid_spec=pltpu.PrefetchScalarGridSpec(
            num_scalar_prefetch=2,
            grid=(num_blocks,),
            in_specs=[pl.BlockSpec((tm, _LANES), lambda i, w, b: (i, 0))],
            out_specs=pl.BlockSpec((tm, _LANES), lambda i, w, b: (i, 0)),
        ),
        compiler_params=pltpu.CompilerParams(
            # Megacore-shard the row axis only when there is work to split.
            dimension_semantics=(
                ("parallel",) if num_blocks > 1 else ("arbitrary",)),
            vmem_limit_bytes=vmem_limit,
        ),
        cost_estimate=cost,
        # x2d is positional input index 2 (after the two prefetch scalars).
        input_output_aliases=({2: 0} if donate_x else {}),
    )(w1, b1, x2d)

    out_flat = out2d.reshape(-1)
    if rem:
        out_flat = out_flat[:total]
    return out_flat.reshape(orig_shape)


if __name__ == "__main__":
    key = jax.random.PRNGKey(0)
    kx, kw, kb = jax.random.split(key, 3)

    # Small NCHW input consistent with the (shape-agnostic) forward.
    x = jax.random.normal(kx, (2, 4, 16, 16), dtype=jnp.float32)
    # Deterministic "torch.rand(1)"-style params (uniform in [0, 1)).
    weight = jax.random.uniform(kw, (1,), dtype=jnp.float32)
    bias = jax.random.uniform(kb, (1,), dtype=jnp.float32)

    y = linear_model_forward(x, weight, bias)
    jax.block_until_ready(y)

    # Sanity check against the pure-JAX reference.
    y_ref = weight[0] * x + bias[0]
    assert jnp.allclose(y, y_ref, atol=1e-6, rtol=1e-6), "mismatch vs reference"

    print("KERNEL_OK")
</pallas_src>

<mosaic_0001>
module attributes {stable_mosaic.version = 11 : i64} {
  func.func @_linear_kernel(%arg0: i32, %arg1: memref<1xf32, #tpu.memory_space<smem>>, %arg2: memref<1xf32, #tpu.memory_space<smem>>, %arg3: memref<16x128xf32, #tpu.memory_space<vmem>>, %arg4: memref<16x128xf32, #tpu.memory_space<vmem>>) attributes {dimension_semantics = [#tpu.dimension_semantics<arbitrary>], iteration_bounds = array<i64: 1>, scalar_prefetch = 2 : i64, scratch_operands = 0 : i64, tpu.core_type = #tpu.core_type<tc>, window_params = [{transform_indices = @transform_0, window_bounds = array<i64: 16, 128>}, {transform_indices = @transform_1, window_bounds = array<i64: 16, 128>}]} {
    %c0 = arith.constant 0 : index
    %c0_0 = arith.constant 0 : index
    %0 = vector.load %arg3[%c0, %c0_0] : memref<16x128xf32, #tpu.memory_space<vmem>>, vector<16x128xf32>
    %c0_1 = arith.constant 0 : index
    %1 = memref.load %arg1[%c0_1] : memref<1xf32, #tpu.memory_space<smem>>
    %2 = vector.broadcast %1 : f32 to vector<16x128xf32>
    %3 = arith.mulf %2, %0 : vector<16x128xf32>
    %c0_2 = arith.constant 0 : index
    %4 = memref.load %arg2[%c0_2] : memref<1xf32, #tpu.memory_space<smem>>
    %5 = vector.broadcast %4 : f32 to vector<16x128xf32>
    %6 = arith.addf %3, %5 : vector<16x128xf32>
    %c0_3 = arith.constant 0 : index
    %c0_4 = arith.constant 0 : index
    %7 = vector.load %arg4[%c0_3, %c0_4] : memref<16x128xf32, #tpu.memory_space<vmem>>, vector<16x128xf32>
    tpu.vector_store %arg4[%c0_3, %c0_4], %6 {strides = array<i32>} : memref<16x128xf32, #tpu.memory_space<vmem>>, vector<16x128xf32>,
    return
  }
  func.func @transform_0(%arg0: i32, %arg1: memref<1xf32, #tpu.memory_space<smem>>, %arg2: memref<1xf32, #tpu.memory_space<smem>>) -> (i32, i32) {
    %c0_i32 = arith.constant 0 : i32
    %c0_i32_0 = arith.constant 0 : i32
    return %arg0, %c0_i32 : i32, i32
  }
  func.func @transform_1(%arg0: i32, %arg1: memref<1xf32, #tpu.memory_space<smem>>, %arg2: memref<1xf32, #tpu.memory_space<smem>>) -> (i32, i32) {
    %c0_i32 = arith.constant 0 : i32
    %c0_i32_0 = arith.constant 0 : i32
    return %arg0, %c0_i32 : i32, i32
  }
}

</mosaic_0001>

<bundles_post_ra>
// kernel: tpu_custom_call.1
= control target key start
LH: loop header
LB: loop body
LE: loop exit
PB: predicated region body
PF: predicated region fallthrough
CT: control target
= control target key end

     0   :  { %10 = vsyncpa [#allocation6], 0  ;;  %s168_s0 = inlined_call_operand.<no memory space> [shape: f32[1], index: 0, kind: input, shape index: {}]   ;;  %s169_s1 = inlined_call_operand.<no memory space> [shape: f32[1], index: 1, kind: input, shape index: {}]   ;;  %s170_s2 = inlined_call_operand.hbm [shape: f32[16,128], index: 2, kind: input, shape index: {}]   ;;  %s171_s3 = inlined_call_operand.hbm [shape: f32[16,128], index: 3, kind: output, shape index: {}]  }
   0x1   :  { %11 = vsyncpa [#allocation7], 0  ;;  %s108_s12 = smov [#allocation5]   ;;  %s60_s16 = scalar_lea.hbm %s170_s2, 256 }
   0x2   :  { %s17_s13 = sshll.u32 %s108_s12, 4  ;;  %p61_p0 = scmp.ne.s32.totalorder %s170_s2, %s60_s16  ;;  %s18_s13 = int_to_ptr.vmem [resolvable:$true] %s17_s13 }
   0x3   :  { %p64_p1 = scmp.lt.u32.totalorder %s60_s16, %s170_s2 }
   0x5   :  { %p66_p2 = pnand %p64_p1, %p61_p0 }
   0x7   :  { %69 = shalt.err (!%p66_p2)
}
   0x8   :  { %s70_s21 = scalar_lea.vmem %s18_s13, 256  ;;  %p75_p4 = scmp.lt.s32.totalorder %s18_s13, %s18_s13 }
   0x9   :  { %p71_p3 = scmp.ne.s32.totalorder %s18_s13, %s70_s21  ;;  %p76_p5 = scmp.lt.s32.totalorder %s70_s21, %s70_s21 }
   0xb   :  { %p77_p6 = por %p76_p5, %p75_p4 }
   0xd   :  { %p78_p7 = pnand %p77_p6, %p71_p3 }
   0xf   :  { %81 = shalt.err (!%p78_p7)
}
  0x10   :  { %s109_s22 = smov 128   ;;  %s110_s23 = smov 8  }
  0x11   :  { %23 = dma.hbm_to_vmem [thread:$0]  %s170_s2, 256, %s18_s13, [#allocation6], %s109_s22, %s109_s22, %s110_s23  }
  0x12   :  { %104 = dma.done.wait [#allocation6], 256  }
  0x13   :  { %105 = vsyncadd [#allocation6], 4294967040  ;;  %v30_v0 = vstv %s168_s0  ;;  %v27_v1 = vld [vmem:[#allocation5] sm:$0xff]  ;;  %v34_v2 = vstv %s169_s1  ;;  %v28_v3 = vld [vmem:[#allocation5 + $0x8] sm:$0xff]  ;;  %s111_s30 = smov [#allocation8]  }
  0x14   :  { %s44_s4 = sshll.u32 %s111_s30, 4  ;;  %v31_v4 = vmul.f32 %v30_v0, %v27_v1  ;;  %v32_v5 = vmul.f32 %v30_v0, %v28_v3  ;;  %s45_s4 = int_to_ptr.vmem [resolvable:$true] %s44_s4 }
  0x15   :  { %s82_s2 = scalar_lea.vmem %s45_s4, 256  ;;  %p87_p9 = scmp.lt.s32.totalorder %s45_s4, %s45_s4 }
  0x16   :  { %v35_v6 = vadd.f32 %v34_v2, %v31_v4  ;;  %v36_v7 = vadd.f32 %v34_v2, %v32_v5  ;;  %p83_p8 = scmp.ne.s32.totalorder %s45_s4, %s82_s2  ;;  %p88_p10 = scmp.lt.s32.totalorder %s82_s2, %s82_s2 }
  0x18   :  { %37 = vst [vmem:[#allocation8] sm:$0xff] %v35_v6  ;;  %38 = vst [vmem:[#allocation8 + $0x8] sm:$0xff] %v36_v7  ;;  %p89_p11 = por %p88_p10, %p87_p9 }
  0x1a   :  { %p90_p12 = pnand %p89_p11, %p83_p8 }
  0x1c   :  { %93 = shalt.err (!%p90_p12)
}
  0x1d   :  { %s94_s1 = scalar_lea.hbm %s171_s3, 256 }
  0x1e   :  { %p95_p13 = scmp.ne.s32.totalorder %s171_s3, %s94_s1  ;;  %p98_p0 = scmp.lt.u32.totalorder %s94_s1, %s171_s3 }
  0x20   :  { %p100_p1 = pnand %p98_p0, %p95_p13 }
  0x22   :  { %103 = shalt.err (!%p100_p1)
}
  0x23   :  { %50 = dma.vmem_to_hbm [thread:$0]  %s45_s4, 256, %s171_s3, [#allocation7], %s109_s22, %s109_s22, %s110_s23  }
  0x24   :  { %106 = dma.done.wait [#allocation7], 256  }
  0x25   :  { %107 = vsyncadd [#allocation7], 4294967040 }
  0x26   :  { %54 = vsyncpa [#allocation6], 1 }
  0x27   :  { %55 = vsyncpa [#allocation7], 1 }

</bundles_post_ra>
